<compile_context>
chip_gen: v6e
topology: v6e:2x2x1
jax: 0.10.0
libtpu: 0.0.40
codegen_flags: <defaults>
</compile_context>

<pallas_src>
import jax
import jax.numpy as jnp
from jax.experimental import pallas as pl
from jax.experimental.pallas import tpu as pltpu


def mlp_item_kernel(x_ref, w1_ref, b1_ref, w2_ref, b2_ref, o_ref):
    # x_ref : (bm, D)    VMEM  -- streamed batch tile, features on lanes
    # w1_ref: (H, D)     VMEM  -- resident first-layer weight (PyTorch layout)
    # b1_ref: (H,)       SMEM
    # w2_ref: (H,)       SMEM  -- Linear(4,1) weight, squeezed
    # b2_ref: (1,)       SMEM
    # o_ref : (1, 1, bm) VMEM  -- lane-dense output slab
    bm = x_ref.shape[0]
    H = w1_ref.shape[0]

    # First layer on the MXU; contracting the minor (feature) axis of both
    # operands puts batch on the lane axis of the result: (H, bm).
    h = jnp.einsum('hd,bd->hb', w1_ref[...], x_ref[...],
                   preferred_element_type=jnp.float32)

    # Bias + ReLU + second layer as H(=4) scalar-broadcast VPU FMAs.
    # (Epilogue is ~tens of bundles; no VLIW slot is near saturation, so this
    #  stays simple and hidden under the x DMA.)
    acc = jnp.full((1, bm), b2_ref[0], dtype=jnp.float32)
    for k in range(H):
        hk = jnp.maximum(h[k:k + 1, :] + b1_ref[k], 0.0)
        acc = acc + w2_ref[k] * hk

    o_ref[...] = acc.reshape(o_ref.shape).astype(o_ref.dtype)


# Batch-tile cap: with the (8,128) native tiling the (bm, 32) f32 x block is
# lane-padded to 128, i.e. ~512*bm bytes per buffer, double-buffered.
# bm = 16384  ->  2 * 16384 * 128 * 4 B = 16 MiB live for x, which fits every
# generation once vmem_limit_bytes is raised to 32 MiB (v7x physical 64 MiB).
_BM_CAP = 16384
_SMALL_B = 1024          # below this, padding x is negligible; use one tile
_VMEM_LIMIT = 32 * 1024 * 1024


def mlp_item_forward(x, w1, b1, w2, b2, *, bm=None):
    """Forward of MLP_ITEM: relu(x @ w1.T + b1) @ w2 + b2.

    x : (B, D) float32
    w1: (H, D) float32   -- PyTorch Linear weight layout (out_features, in_features)
    b1: (H,)   float32
    w2: (H,)   float32   -- PyTorch Linear(H, 1).weight squeezed to shape (H,)
    b2: (1,)   float32
    returns (B, 1) float32
    """
    B, D = x.shape
    H = w1.shape[0]
    assert w1.shape == (H, D)
    assert b1.shape == (H,)
    assert w2.shape == (H,), "pass Linear(4,1).weight squeezed to shape (H,)"
    assert b2.shape == (1,)

    if bm is None:
        if B <= _SMALL_B:
            # Tiny batch: one lane-dense tile; padding cost is negligible.
            bm = 128 * pl.cdiv(B, 128)
        else:
            # ~B/4 rounded to 128 -> >= 4 tiles so the "parallel" batch grid
            # splits evenly across v7x's 2 TensorCores; capped for VMEM.
            bm = max(128, min(_BM_CAP, 128 * pl.cdiv(pl.cdiv(B, 4), 128)))

    n_tiles = pl.cdiv(B, bm)
    b_pad = n_tiles * bm
    if b_pad != B and B <= _SMALL_B:
        # Cheap for tiny batches only.  For large B we rely on Pallas's
        # partial-final-block handling: tail rows read unspecified data and
        # produce garbage output rows, which the final [:B] slice discards
        # (rows are independent), avoiding a full HBM copy of x.
        x = jnp.pad(x, ((0, b_pad - B), (0, 0)))

    # Advisory cost hint: the call is entirely HBM-bound on x.
    cost = pl.CostEstimate(
        flops=2 * B * H * (D + 1),
        transcendentals=0,
        bytes_accessed=B * D * 4 + B * 4 + (H * D + 2 * H + 1) * 4,
    )

    out = pl.pallas_call(
        mlp_item_kernel,
        out_shape=jax.ShapeDtypeStruct((n_tiles, 1, bm), x.dtype),
        grid_spec=pltpu.PrefetchScalarGridSpec(
            num_scalar_prefetch=0,
            grid=(n_tiles,),
            in_specs=[
                pl.BlockSpec((bm, D), lambda i: (i, 0)),             # x (streamed)
                pl.BlockSpec((H, D), lambda i: (0, 0)),              # w1 (resident)
                pl.BlockSpec(memory_space=pltpu.MemorySpace.SMEM),   # b1
                pl.BlockSpec(memory_space=pltpu.MemorySpace.SMEM),   # w2
                pl.BlockSpec(memory_space=pltpu.MemorySpace.SMEM),   # b2
            ],
            out_specs=pl.BlockSpec((1, 1, bm), lambda i: (i, 0, 0)),
        ),
        compiler_params=pltpu.CompilerParams(
            dimension_semantics=("parallel",),
            vmem_limit_bytes=_VMEM_LIMIT,
        ),
        cost_estimate=cost,
    )(x, w1, b1, w2, b2)

    # Lane-dense slab -> (B, 1); pure layout plumbing in the wrapper.
    return out.reshape(b_pad, 1)[:B]


if __name__ == "__main__":
    # Small shapes consistent with the module: input_size=32, batch=16.
    input_size = 32
    batch = 16

    key = jax.random.PRNGKey(0)
    x = jax.random.normal(key, (batch, input_size), dtype=jnp.float32)

    # Deterministic parameters matching MLP_ITEM.init_weights():
    #   every Linear weight filled with 1.0, every bias with 0.0.
    w1 = jnp.ones((4, input_size), dtype=jnp.float32)   # Linear(input_size, 4).weight
    b1 = jnp.zeros((4,), dtype=jnp.float32)
    w2 = jnp.ones((4,), dtype=jnp.float32)              # Linear(4, 1).weight (squeezed)
    b2 = jnp.zeros((1,), dtype=jnp.float32)

    out = mlp_item_forward(x, w1, b1, w2, b2)
    out = jax.block_until_ready(out)

    # Pure-JAX reference of the PyTorch forward.
    ref = jnp.maximum(x @ w1.T + b1[None, :], 0.0) @ w2[:, None] + b2[None, :]
    assert out.shape == (batch, 1)
    assert jnp.allclose(out, ref, atol=1e-5, rtol=1e-5)

    print("KERNEL_OK")
</pallas_src>

<mosaic_0001>
module attributes {stable_mosaic.version = 11 : i64} {
  func.func @mlp_item_kernel(%arg0: i32, %arg1: memref<128x32xf32, #tpu.memory_space<vmem>>, %arg2: memref<4x32xf32, #tpu.memory_space<vmem>>, %arg3: memref<4xf32, #tpu.memory_space<smem>>, %arg4: memref<4xf32, #tpu.memory_space<smem>>, %arg5: memref<1xf32, #tpu.memory_space<smem>>, %arg6: memref<1x1x128xf32, #tpu.memory_space<vmem>>) attributes {dimension_semantics = [#tpu.dimension_semantics<parallel>], iteration_bounds = array<i64: 1>, scalar_prefetch = 0 : i64, scratch_operands = 0 : i64, tpu.core_type = #tpu.core_type<tc>, window_params = [{transform_indices = @transform_0, window_bounds = array<i64: 128, 32>}, {pipeline_mode = #tpu.pipeline_mode<synchronous>, transform_indices = @transform_1, window_bounds = array<i64: 4, 32>}, {transform_indices = @transform_2, window_bounds = array<i64: 4>}, {transform_indices = @transform_3, window_bounds = array<i64: 4>}, {transform_indices = @transform_4, window_bounds = array<i64: 1>}, {transform_indices = @transform_5, window_bounds = array<i64: 1, 1, 128>}]} {
    %c0 = arith.constant 0 : index
    %c0_0 = arith.constant 0 : index
    %0 = vector.load %arg2[%c0, %c0_0] : memref<4x32xf32, #tpu.memory_space<vmem>>, vector<4x32xf32>
    %c0_1 = arith.constant 0 : index
    %c0_2 = arith.constant 0 : index
    %1 = vector.load %arg1[%c0_1, %c0_2] : memref<128x32xf32, #tpu.memory_space<vmem>>, vector<128x32xf32>
    "tpu.trace_start"() <{level = 10 : i32, message = "hd,bd->hb"}> : () -> ()
    %cst = arith.constant dense<0.000000e+00> : vector<4x128xf32>
    %2 = tpu.matmul %0, %1, %cst {dimension_numbers = #tpu.dot_dimension_numbers<[1], [1], [0], [0], [0, 0, 1, 0], [], []>} : vector<4x32xf32>, vector<128x32xf32>, vector<4x128xf32> -> vector<4x128xf32>
    "tpu.trace_stop"() : () -> ()
    %c0_3 = arith.constant 0 : index
    %3 = memref.load %arg5[%c0_3] : memref<1xf32, #tpu.memory_space<smem>>
    %4 = vector.broadcast %3 : f32 to vector<1x128xf32>
    %5 = vector.extract_strided_slice %2 {offsets = [0, 0], sizes = [1, 128], strides = [1, 1]} : vector<4x128xf32> to vector<1x128xf32>
    %c0_4 = arith.constant 0 : index
    %6 = memref.load %arg3[%c0_4] : memref<4xf32, #tpu.memory_space<smem>>
    %7 = vector.broadcast %6 : f32 to vector<1x128xf32>
    %8 = arith.addf %5, %7 : vector<1x128xf32>
    %cst_5 = arith.constant 0.000000e+00 : f32
    %9 = vector.broadcast %cst_5 : f32 to vector<1x128xf32>
    %10 = arith.maximumf %8, %9 : vector<1x128xf32>
    %c0_6 = arith.constant 0 : index
    %11 = memref.load %arg4[%c0_6] : memref<4xf32, #tpu.memory_space<smem>>
    %12 = vector.broadcast %11 : f32 to vector<1x128xf32>
    %13 = arith.mulf %12, %10 : vector<1x128xf32>
    %14 = arith.addf %4, %13 : vector<1x128xf32>
    %15 = vector.extract_strided_slice %2 {offsets = [1, 0], sizes = [1, 128], strides = [1, 1]} : vector<4x128xf32> to vector<1x128xf32>
    %c1 = arith.constant 1 : index
    %16 = memref.load %arg3[%c1] : memref<4xf32, #tpu.memory_space<smem>>
    %17 = vector.broadcast %16 : f32 to vector<1x128xf32>
    %18 = arith.addf %15, %17 : vector<1x128xf32>
    %cst_7 = arith.constant 0.000000e+00 : f32
    %19 = vector.broadcast %cst_7 : f32 to vector<1x128xf32>
    %20 = arith.maximumf %18, %19 : vector<1x128xf32>
    %c1_8 = arith.constant 1 : index
    %21 = memref.load %arg4[%c1_8] : memref<4xf32, #tpu.memory_space<smem>>
    %22 = vector.broadcast %21 : f32 to vector<1x128xf32>
    %23 = arith.mulf %22, %20 : vector<1x128xf32>
    %24 = arith.addf %14, %23 : vector<1x128xf32>
    %25 = vector.extract_strided_slice %2 {offsets = [2, 0], sizes = [1, 128], strides = [1, 1]} : vector<4x128xf32> to vector<1x128xf32>
    %c2 = arith.constant 2 : index
    %26 = memref.load %arg3[%c2] : memref<4xf32, #tpu.memory_space<smem>>
    %27 = vector.broadcast %26 : f32 to vector<1x128xf32>
    %28 = arith.addf %25, %27 : vector<1x128xf32>
    %cst_9 = arith.constant 0.000000e+00 : f32
    %29 = vector.broadcast %cst_9 : f32 to vector<1x128xf32>
    %30 = arith.maximumf %28, %29 : vector<1x128xf32>
    %c2_10 = arith.constant 2 : index
    %31 = memref.load %arg4[%c2_10] : memref<4xf32, #tpu.memory_space<smem>>
    %32 = vector.broadcast %31 : f32 to vector<1x128xf32>
    %33 = arith.mulf %32, %30 : vector<1x128xf32>
    %34 = arith.addf %24, %33 : vector<1x128xf32>
    %35 = vector.extract_strided_slice %2 {offsets = [3, 0], sizes = [1, 128], strides = [1, 1]} : vector<4x128xf32> to vector<1x128xf32>
    %c3 = arith.constant 3 : index
    %36 = memref.load %arg3[%c3] : memref<4xf32, #tpu.memory_space<smem>>
    %37 = vector.broadcast %36 : f32 to vector<1x128xf32>
    %38 = arith.addf %35, %37 : vector<1x128xf32>
    %cst_11 = arith.constant 0.000000e+00 : f32
    %39 = vector.broadcast %cst_11 : f32 to vector<1x128xf32>
    %40 = arith.maximumf %38, %39 : vector<1x128xf32>
    %c3_12 = arith.constant 3 : index
    %41 = memref.load %arg4[%c3_12] : memref<4xf32, #tpu.memory_space<smem>>
    %42 = vector.broadcast %41 : f32 to vector<1x128xf32>
    %43 = arith.mulf %42, %40 : vector<1x128xf32>
    %44 = arith.addf %34, %43 : vector<1x128xf32>
    %45 = vector.shape_cast %44 : vector<1x128xf32> to vector<1x1x128xf32>
    %c0_13 = arith.constant 0 : index
    %c0_14 = arith.constant 0 : index
    %c0_15 = arith.constant 0 : index
    %46 = vector.load %arg6[%c0_13, %c0_14, %c0_15] : memref<1x1x128xf32, #tpu.memory_space<vmem>>, vector<1x1x128xf32>
    tpu.vector_store %arg6[%c0_13, %c0_14, %c0_15], %45 {strides = array<i32>} : memref<1x1x128xf32, #tpu.memory_space<vmem>>, vector<1x1x128xf32>,
    return
  }
  func.func @transform_0(%arg0: i32) -> (i32, i32) {
    %c0_i32 = arith.constant 0 : i32
    %c0_i32_0 = arith.constant 0 : i32
    return %arg0, %c0_i32 : i32, i32
  }
  func.func @transform_1(%arg0: i32) -> (i32, i32) {
    %c0_i32 = arith.constant 0 : i32
    %c0_i32_0 = arith.constant 0 : i32
    %c0_i32_1 = arith.constant 0 : i32
    return %c0_i32, %c0_i32_0 : i32, i32
  }
  func.func @transform_2(%arg0: i32) -> i32 {
    %c0_i32 = arith.constant 0 : i32
    %c0_i32_0 = arith.constant 0 : i32
    return %c0_i32 : i32
  }
  func.func @transform_3(%arg0: i32) -> i32 {
    %c0_i32 = arith.constant 0 : i32
    %c0_i32_0 = arith.constant 0 : i32
    return %c0_i32 : i32
  }
  func.func @transform_4(%arg0: i32) -> i32 {
    %c0_i32 = arith.constant 0 : i32
    %c0_i32_0 = arith.constant 0 : i32
    return %c0_i32 : i32
  }
  func.func @transform_5(%arg0: i32) -> (i32, i32, i32) {
    %c0_i32 = arith.constant 0 : i32
    %c0_i32_0 = arith.constant 0 : i32
    %c0_i32_1 = arith.constant 0 : i32
    return %arg0, %c0_i32, %c0_i32_0 : i32, i32, i32
  }
}

</mosaic_0001>

<bundles_post_ra>
// kernel: tpu_custom_call.1
= control target key start
LH: loop header
LB: loop body
LE: loop exit
PB: predicated region body
PF: predicated region fallthrough
CT: control target
= control target key end

     0   :  { %11 = vsyncpa [#allocation5], 0  ;;  %s491_s0 = inlined_call_operand.vmem [shape: f32[128,32], index: 0, kind: input, shape index: {}]   ;;  %s492_s1 = inlined_call_operand.vmem [shape: f32[4,32], index: 1, kind: input, shape index: {}]   ;;  %s493_s2 = inlined_call_operand.vmem [shape: f32[4], index: 2, kind: input, shape index: {}]   ;;  %s494_s3 = inlined_call_operand.vmem [shape: f32[4], index: 3, kind: input, shape index: {}]   ;;  %s495_s4 = inlined_call_operand.<no memory space> [shape: f32[1], index: 4, kind: input, shape index: {}]   ;;  %s496_s5 = inlined_call_operand.hbm [shape: f32[1,1,128], index: 5, kind: output, shape index: {}]  }
   0x1   :  { %12 = vsyncpa [#allocation7], 0 }
   0x2   :  { %13 = vsyncpa [#allocation4], 0  ;;  %s24_s20 = sshll.u32 %s493_s2, 4  ;;  %s34_s23 = sshll.u32 %s494_s3, 4  ;;  %s25_s20 = int_to_ptr.vmem [resolvable:$true] %s24_s20  ;;  %s35_s23 = int_to_ptr.vmem [resolvable:$true] %s34_s23 }
   0x3   :  { %s326_s24 = scalar_lea.vmem %s25_s20, 16  ;;  %p331_p1 = scmp.lt.s32.totalorder %s25_s20, %s25_s20 }
   0x4   :  { %p327_p0 = scmp.ne.s32.totalorder %s25_s20, %s326_s24  ;;  %p332_p2 = scmp.lt.s32.totalorder %s326_s24, %s326_s24 }
   0x6   :  { %p333_p3 = por %p332_p2, %p331_p1 }
   0x8   :  { %p334_p4 = pnand %p333_p3, %p327_p0 }
   0xa   :  { %337 = shalt.err (!%p334_p4)
}
   0xb   :  { %s376_s25 = smov [#allocation3]   ;;  %s338_s26 = scalar_lea.vmem %s35_s23, 16 }
   0xc   :  { %27 = dma.vmem_to_smem %s25_s20, 16, %s376_s25, [#allocation5]  }
   0xd   :  { %p339_p5 = scmp.ne.s32.totalorder %s35_s23, %s338_s26  ;;  %p343_p6 = scmp.lt.s32.totalorder %s35_s23, %s35_s23 }
   0xe   :  { %p344_p7 = scmp.lt.s32.totalorder %s338_s26, %s338_s26 }
  0x10   :  { %p345_p8 = por %p344_p7, %p343_p6 }
  0x12   :  { %p346_p9 = pnand %p345_p8, %p339_p5 }
  0x14   :  { %349 = shalt.err (!%p346_p9)
}
  0x15   :  { %s377_s2 = smov [#allocation6]  }
  0x16   :  { %37 = dma.vmem_to_smem %s35_s23, 16, %s377_s2, [#allocation7]  }
  0x17   :  { %370 = dma.done.wait [#allocation5], 16  }
  0x18   :  { %371 = vsyncadd [#allocation5], 4294967280 }
  0x19   :  { %372 = dma.done.wait [#allocation7], 16  }
  0x1a   :  { %373 = vsyncadd [#allocation7], 4294967280 }
  0x1b   :  { %46 = sfence }
  0x1c   :  { %v63_v0 = vld [vmem:[%s491_s0 + $0x78] sm:$0xff]  ;;  %vm64_vm0 = vcmask 261120   ;;  %v378_v1 = vmov 0.0   ;;  %vm379_vm1 = vmmov 0   ;;  %v62_v2 = vld [vmem:[%s491_s0 + $0x70] sm:$0xff]  ;;  %v61_v3 = vld [vmem:[%s491_s0 + $0x68] sm:$0xff]  ;;  %v187_v35 = vstv %s495_s4 }
  0x1d   :  { %286 = vmatprep.subr.mxu0 %v378_v1  ;;  %318 = vmatprep.mubr.msk.f32.mxu0 %vm379_vm1, %v378_v1  ;;  %v60_v4 = vld [vmem:[%s491_s0 + $0x60] sm:$0xff]  ;;  %v59_v5 = vld [vmem:[%s491_s0 + $0x58] sm:$0xff]  ;;  %v58_v6 = vld [vmem:[%s491_s0 + $0x50] sm:$0xff]  ;;  %s188_s8 = sld [smem:[#allocation3]]  ;;  %s380_s16 = smov [#allocation8]  }
  0x1e   :  { %287 = vmatpush3.xpose.msk.msra.mxu0 %vm64_vm0, %v63_v0  ;;  %v57_v7 = vld [vmem:[%s491_s0 + $0x48] sm:$0xff]  ;;  %v56_v8 = vld [vmem:[%s491_s0 + $0x40] sm:$0xff]  ;;  %v55_v9 = vld [vmem:[%s491_s0 + $0x38] sm:$0xff]  ;;  %s263_s9 = sld [smem:[#allocation3 + $0x1]]  ;;  %s236_s17 = sshll.u32 %s380_s16, 4  ;;  %s237_s17 = int_to_ptr.vmem [resolvable:$true] %s236_s17 }
  0x1f   :  { %288 = vmatprep.subr.mxu0 %v378_v1  ;;  %v54_v10 = vld [vmem:[%s491_s0 + $0x30] sm:$0xff]  ;;  %v53_v11 = vld [vmem:[%s491_s0 + $0x28] sm:$0xff]  ;;  %v52_v12 = vld [vmem:[%s491_s0 + $0x20] sm:$0xff]  ;;  %s265_s10 = sld [smem:[#allocation3 + $0x2]]  ;;  %s350_s18 = scalar_lea.vmem %s237_s17, 16 }
  0x20   :  { %v51_v13 = vld [vmem:[%s491_s0 + $0x18] sm:$0xff]  ;;  %v50_v14 = vld [vmem:[%s491_s0 + $0x10] sm:$0xff]  ;;  %v49_v15 = vld [vmem:[%s491_s0 + $0x8] sm:$0xff]  ;;  %s267_s11 = sld [smem:[#allocation3 + $0x3]]  ;;  %p351_p10 = scmp.ne.s32.totalorder %s237_s17, %s350_s18 }
  0x21   :  { %v48_v16 = vld [vmem:[%s491_s0] sm:$0xff]  ;;  %s192_s12 = sld [smem:[#allocation6]]  ;;  %s354_s19 = scalar_lea.vmem %s237_s17, 32 }
  0x22   :  { %289 = vmatpush3.xpose.msk.msra.mxu0 %vm64_vm0, %v62_v2  ;;  %v47_v17 = vld [vmem:[%s492_s1] sm:$0xf]  ;;  %s264_s13 = sld [smem:[#allocation6 + $0x1]]  ;;  %p355_p11 = scmp.lt.s32.totalorder %s237_s17, %s237_s17 }
  0x23   :  { %290 = vmatprep.subr.mxu0 %v378_v1  ;;  %s266_s14 = sld [smem:[#allocation6 + $0x2]]  ;;  %v189_v18 = vstv %s188_s8  ;;  %p356_p12 = scmp.lt.s32.totalorder %s354_s19, %s350_s18 }
  0x24   :  { %s268_s15 = sld [smem:[#allocation6 + $0x3]]  ;;  %v197_v19 = vstv %s263_s9 }
  0x25   :  { %v208_v20 = vstv %s265_s10  ;;  %p357_p13 = por %p356_p12, %p355_p11 }
  0x26   :  { %291 = vmatpush3.xpose.msk.msra.mxu0 %vm64_vm0, %v61_v3  ;;  %v219_v21 = vstv %s267_s11 }
  0x27   :  { %292 = vmatprep.subr.mxu0 %v378_v1  ;;  %v193_v27 = vstv %s192_s12  ;;  %p358_p0 = pnand %p357_p13, %p351_p10 }
  0x28   :  { %v201_v29 = vstv %s264_s13 }
  0x29   :  { %v212_v30 = vstv %s266_s14 }
  0x2a   :  { %293 = vmatpush3.xpose.msk.msra.mxu0 %vm64_vm0, %v60_v4  ;;  %v223_v36 = vstv %s268_s15 }
  0x2b   :  { %294 = vmatprep.subr.mxu0 %v378_v1 }
  0x2e   :  { %295 = vmatpush3.xpose.msk.msra.mxu0 %vm64_vm0, %v59_v5 }
  0x2f   :  { %296 = vmatprep.subr.mxu0 %v378_v1 }
  0x32   :  { %297 = vmatpush3.xpose.msk.msra.mxu0 %vm64_vm0, %v58_v6 }
  0x33   :  { %298 = vmatprep.subr.mxu0 %v378_v1 }
  0x36   :  { %299 = vmatpush3.xpose.msk.msra.mxu0 %vm64_vm0, %v57_v7 }
  0x37   :  { %300 = vmatprep.subr.mxu0 %v378_v1 }
  0x3a   :  { %301 = vmatpush3.xpose.msk.msra.mxu0 %vm64_vm0, %v56_v8 }
  0x3b   :  { %302 = vmatprep.subr.mxu0 %v378_v1 }
  0x3e   :  { %303 = vmatpush3.xpose.msk.msra.mxu0 %vm64_vm0, %v55_v9 }
  0x3f   :  { %304 = vmatprep.subr.mxu0 %v378_v1 }
  0x42   :  { %305 = vmatpush3.xpose.msk.msra.mxu0 %vm64_vm0, %v54_v10 }
  0x43   :  { %306 = vmatprep.subr.mxu0 %v378_v1 }
  0x46   :  { %307 = vmatpush3.xpose.msk.msra.mxu0 %vm64_vm0, %v53_v11 }
  0x47   :  { %308 = vmatprep.subr.mxu0 %v378_v1 }
  0x4a   :  { %309 = vmatpush3.xpose.msk.msra.mxu0 %vm64_vm0, %v52_v12 }
  0x4b   :  { %310 = vmatprep.subr.mxu0 %v378_v1 }
  0x4e   :  { %311 = vmatpush3.xpose.msk.msra.mxu0 %vm64_vm0, %v51_v13 }
  0x4f   :  { %312 = vmatprep.subr.mxu0 %v378_v1 }
  0x52   :  { %313 = vmatpush3.xpose.msk.msra.mxu0 %vm64_vm0, %v50_v14 }
  0x53   :  { %314 = vmatprep.subr.mxu0 %v378_v1 }
  0x56   :  { %315 = vmatpush3.xpose.msk.msra.mxu0 %vm64_vm0, %v49_v15 }
  0x57   :  { %316 = vmatprep.subr.mxu0 %v378_v1 }
  0x5a   :  { %317 = vmatpush3.xpose.msk.msra.mxu0 %vm64_vm0, %v48_v16 }
  0x5d   :  { %319 = vmatmul.mubr.msk.f32.vlgmr.msra.gmra.mxu0 %vm64_vm0, %v47_v17 }
 0x11d   :  { %v182_v22 = vpop.f32.mrf.mxu0 }
 0x11e   :  { %v190_v23 = vadd.f32 %v189_v18, %v182_v22  ;;  %v198_v24 = vadd.f32 %v197_v19, %v182_v22  ;;  %v209_v25 = vadd.f32 %v208_v20, %v182_v22  ;;  %v220_v26 = vadd.f32 %v219_v21, %v182_v22 }
 0x11f   :  { %v320_v28 = vpop.f32.mrf.mxu0 }
 0x120   :  { %v191_v31 = vmax.f32 %v190_v23, 0.0  ;;  %v199_v32 = vmax.f32 %v198_v24, 0.0  ;;  %v210_v33 = vmax.f32 %v209_v25, 0.0  ;;  %v221_v34 = vmax.f32 %v220_v26, 0.0 }
 0x122   :  { %v194_v37 = vmul.f32 %v193_v27, %v191_v31  ;;  %v202_v38 = vmul.f32 %v201_v29, %v199_v32  ;;  %v213_v39 = vmul.f32 %v212_v30, %v210_v33  ;;  %v224_v42 = vmul.f32 %v223_v36, %v221_v34 }
 0x124   :  { %v195_v40 = vadd.f32 %v194_v37, %v187_v35  ;;  %v204_v41 = vrot.slane %v202_v38, 1  ;;  %v215_v44 = vrot.slane %v213_v39, 2  ;;  %v226_v46 = vrot.slane %v224_v42, 3 }
 0x126   :  { %v206_v43 = vadd.f32 %v204_v41, %v195_v40 }
 0x128   :  { %v217_v45 = vadd.f32 %v215_v44, %v206_v43 }
 0x12a   :  { %v228_v47 = vadd.f32 %v226_v46, %v217_v45 }
 0x12c   :  { %229 = vst [vmem:[#allocation8] sm:$0x1] %v228_v47 }
 0x12d   :  { %361 = shalt.err (!%p358_p0)
}
 0x12e   :  { %239 = dma.vmem_to_hbm [thread:$0]  %s237_s17, 16, %s496_s5, [#allocation4]  }
 0x12f   :  { %374 = dma.done.wait [#allocation4], 16  }
 0x130   :  { %375 = vsyncadd [#allocation4], 4294967280 }
 0x131   :  { %243 = vsyncpa [#allocation4], 1 }
 0x132   :  { %244 = vsyncpa [#allocation5], 1 }
 0x133   :  { %245 = vsyncpa [#allocation7], 1 }

</bundles_post_ra>
